<compile_context>
chip_gen: v6e
topology: v6e:2x2x1
jax: 0.10.0
libtpu: 0.0.40
codegen_flags: <defaults>
</compile_context>

<pallas_src>
import jax
import jax.numpy as jnp
from jax.experimental import pallas as pl
from jax.experimental.pallas import tpu as pltpu

_LANES = 128           # vreg lane width
_MAX_TILE_ROWS = 4096  # 4096 x 128 f32 = 2 MiB block; 8 MiB pipelined (v5e-safe)
_MIN_TILE_ROWS = 256   # keep per-step overhead amortized
_TARGET_GRID = 8       # aim for >= 8 grid steps on big inputs (v7x megacore)
_SMALL_N = 2048        # below this, plain jnp beats a kernel launch


def _round_up(a: int, m: int) -> int:
    return ((a + m - 1) // m) * m


def _linear_kernel(w_ref, b_ref, x_ref, o_ref):
    # w_ref, b_ref: (1, 1) f32 scalars in SMEM
    # x_ref, o_ref: (tile_rows, 128) lane-dense tiles in VMEM (caller dtype)
    w = w_ref[0, 0]
    b = b_ref[0, 0]
    x = x_ref[...].astype(jnp.float32)      # compute in f32 on the VPU
    o_ref[...] = (x * w + b).astype(o_ref.dtype)


def _pallas_main(x_main_flat: jax.Array, w_smem: jax.Array, b_smem: jax.Array,
                 out_dtype) -> jax.Array:
    """Run the kernel on a lane-aligned flat chunk (length % 128 == 0)."""
    n_main = x_main_flat.shape[0]
    rows = n_main // _LANES
    x_slab = x_main_flat.reshape(rows, _LANES)   # contiguous reshape: free

    # Tile selection: big blocks, but enough grid steps for megacore, and a
    # single full-extent block for small row counts (always layout-legal).
    target = _round_up(pl.cdiv(rows, _TARGET_GRID), 8)
    tile_rows = max(_MIN_TILE_ROWS, min(_MAX_TILE_ROWS, target))
    if tile_rows >= rows:
        tile_rows = rows                          # one block == full array
    grid = (pl.cdiv(rows, tile_rows),)            # ragged last block is masked

    out_slab = pl.pallas_call(
        _linear_kernel,
        out_shape=jax.ShapeDtypeStruct((rows, _LANES), out_dtype),
        grid_spec=pltpu.PrefetchScalarGridSpec(
            num_scalar_prefetch=0,
            grid=grid,
            in_specs=[
                pl.BlockSpec(memory_space=pltpu.SMEM),                 # weight
                pl.BlockSpec(memory_space=pltpu.SMEM),                 # bias
                pl.BlockSpec((tile_rows, _LANES), lambda i: (i, 0)),   # x tile
            ],
            out_specs=pl.BlockSpec((tile_rows, _LANES), lambda i: (i, 0)),
        ),
        compiler_params=pltpu.CompilerParams(
            dimension_semantics=("parallel",),    # independent streaming tiles
        ),
    )(w_smem, b_smem, x_slab)

    return out_slab.reshape(n_main)               # contiguous reshape: free


def linear_forward(x: jax.Array, weight: jax.Array, bias: jax.Array) -> jax.Array:
    """y = x @ W^T + b for nn.Linear(1, 1).

    x: (..., 1); weight: (1, 1) (out, in); bias: (1,) -> output (..., 1) in x.dtype.
    """
    orig_shape = x.shape
    assert orig_shape[-1] == 1, "in_features must be 1"
    assert weight.shape == (1, 1) and bias.shape == (1,)

    out_dtype = x.dtype
    x_flat = x.reshape(-1)                        # (..., 1) -> (N,) : free
    n = x_flat.shape[0]

    w32 = weight.astype(jnp.float32).reshape(())
    b32 = bias.astype(jnp.float32).reshape(())

    # Small-N bypass: a kernel launch is pure overhead for tiny batches.
    if n < _SMALL_N:
        y = (x_flat.astype(jnp.float32) * w32 + b32).astype(out_dtype)
        return y.reshape(orig_shape)

    w_smem = weight.reshape(1, 1).astype(jnp.float32)
    b_smem = bias.reshape(1, 1).astype(jnp.float32)

    n_main = (n // _LANES) * _LANES

    if n_main == n:
        # Fast path: lane-aligned, zero extra HBM copies.
        y_main = _pallas_main(x_flat, w_smem, b_smem, out_dtype)
        return y_main.reshape(orig_shape)

    # Ragged path: kernel on the aligned body, <128-element tail in plain jnp.
    y_main = _pallas_main(x_flat[:n_main], w_smem, b_smem, out_dtype)
    tail = x_flat[n_main:]
    y_tail = (tail.astype(jnp.float32) * w32 + b32).astype(out_dtype)
    return jnp.concatenate([y_main, y_tail]).reshape(orig_shape)


if __name__ == "__main__":
    key = jax.random.PRNGKey(0)
    kx, kw, kb, kx2, kx3, kx4 = jax.random.split(key, 6)

    # Deterministic parameter init (nn.Linear(1, 1) -> weight [1,1], bias [1]).
    weight = jax.random.uniform(kw, (1, 1), dtype=jnp.float32, minval=-1.0, maxval=1.0)
    bias = jax.random.uniform(kb, (1,), dtype=jnp.float32, minval=-1.0, maxval=1.0)

    def ref(x):
        return x @ weight.T + bias

    # 1) Tiny batch (small-N bypass path), as the module implies: x is [N, 1].
    x = jax.random.normal(kx, (8, 1), dtype=jnp.float32)
    y = jax.block_until_ready(linear_forward(x, weight, bias))
    assert y.shape == (8, 1) and y.dtype == x.dtype
    assert jnp.allclose(y, ref(x), atol=1e-6), "mismatch vs reference (N=8)"

    # 2) Non-aligned small batch (still bypass).
    x2 = jax.random.normal(kx2, (300, 1), dtype=jnp.float32)
    y2 = jax.block_until_ready(linear_forward(x2, weight, bias))
    assert jnp.allclose(y2, ref(x2), atol=1e-6), "mismatch vs reference (N=300)"

    # 3) Lane-aligned batch: exercises the Pallas kernel fast path (zero-copy).
    x3 = jax.random.normal(kx3, (8192, 1), dtype=jnp.float32)
    y3 = jax.block_until_ready(linear_forward(x3, weight, bias))
    assert y3.shape == (8192, 1)
    assert jnp.allclose(y3, ref(x3), atol=1e-6), "mismatch vs reference (N=8192)"

    # 4) Ragged batch: Pallas body + jnp tail, multi-tile grid with partial block.
    x4 = jax.random.normal(kx4, (70000, 1), dtype=jnp.float32)
    y4 = jax.block_until_ready(linear_forward(x4, weight, bias))
    assert y4.shape == (70000, 1)
    assert jnp.allclose(y4, ref(x4), atol=1e-6), "mismatch vs reference (N=70000)"

    print("KERNEL_OK")
</pallas_src>

<mosaic_0001>
module attributes {stable_mosaic.version = 11 : i64} {
  func.func @_linear_kernel(%arg0: i32, %arg1: memref<1x1xf32, #tpu.memory_space<smem>>, %arg2: memref<1x1xf32, #tpu.memory_space<smem>>, %arg3: memref<64x128xf32, #tpu.memory_space<vmem>>, %arg4: memref<64x128xf32, #tpu.memory_space<vmem>>) attributes {dimension_semantics = [#tpu.dimension_semantics<parallel>], iteration_bounds = array<i64: 1>, scalar_prefetch = 0 : i64, scratch_operands = 0 : i64, tpu.core_type = #tpu.core_type<tc>, window_params = [{transform_indices = @transform_0, window_bounds = array<i64: 1, 1>}, {transform_indices = @transform_1, window_bounds = array<i64: 1, 1>}, {transform_indices = @transform_2, window_bounds = array<i64: 64, 128>}, {transform_indices = @transform_3, window_bounds = array<i64: 64, 128>}]} {
    %c0 = arith.constant 0 : index
    %c0_0 = arith.constant 0 : index
    %0 = memref.load %arg1[%c0, %c0_0] : memref<1x1xf32, #tpu.memory_space<smem>>
    %c0_1 = arith.constant 0 : index
    %c0_2 = arith.constant 0 : index
    %1 = memref.load %arg2[%c0_1, %c0_2] : memref<1x1xf32, #tpu.memory_space<smem>>
    %c0_3 = arith.constant 0 : index
    %c0_4 = arith.constant 0 : index
    %2 = vector.load %arg3[%c0_3, %c0_4] : memref<64x128xf32, #tpu.memory_space<vmem>>, vector<64x128xf32>
    %3 = vector.broadcast %0 : f32 to vector<64x128xf32>
    %4 = arith.mulf %2, %3 : vector<64x128xf32>
    %5 = vector.broadcast %1 : f32 to vector<64x128xf32>
    %6 = arith.addf %4, %5 : vector<64x128xf32>
    %c0_5 = arith.constant 0 : index
    %c0_6 = arith.constant 0 : index
    %7 = vector.load %arg4[%c0_5, %c0_6] : memref<64x128xf32, #tpu.memory_space<vmem>>, vector<64x128xf32>
    tpu.vector_store %arg4[%c0_5, %c0_6], %6 {strides = array<i32>} : memref<64x128xf32, #tpu.memory_space<vmem>>, vector<64x128xf32>,
    return
  }
  func.func @transform_0(%arg0: i32) -> (i32, i32) {
    %c0_i32 = arith.constant 0 : i32
    %c0_i32_0 = arith.constant 0 : i32
    %c0_i32_1 = arith.constant 0 : i32
    return %c0_i32, %c0_i32_0 : i32, i32
  }
  func.func @transform_1(%arg0: i32) -> (i32, i32) {
    %c0_i32 = arith.constant 0 : i32
    %c0_i32_0 = arith.constant 0 : i32
    %c0_i32_1 = arith.constant 0 : i32
    return %c0_i32, %c0_i32_0 : i32, i32
  }
  func.func @transform_2(%arg0: i32) -> (i32, i32) {
    %c0_i32 = arith.constant 0 : i32
    %c0_i32_0 = arith.constant 0 : i32
    return %arg0, %c0_i32 : i32, i32
  }
  func.func @transform_3(%arg0: i32) -> (i32, i32) {
    %c0_i32 = arith.constant 0 : i32
    %c0_i32_0 = arith.constant 0 : i32
    return %arg0, %c0_i32 : i32, i32
  }
}

</mosaic_0001>

<bundles_post_ra>
// kernel: tpu_custom_call.1
= control target key start
LH: loop header
LB: loop body
LE: loop exit
PB: predicated region body
PF: predicated region fallthrough
CT: control target
= control target key end

     0   :  { %10 = vsyncpa [#allocation5], 0  ;;  %s174_s0 = inlined_call_operand.<no memory space> [shape: f32[1,1], index: 0, kind: input, shape index: {}]   ;;  %s175_s1 = inlined_call_operand.<no memory space> [shape: f32[1,1], index: 1, kind: input, shape index: {}]   ;;  %s176_s2 = inlined_call_operand.hbm [shape: f32[64,128], index: 2, kind: input, shape index: {}]   ;;  %s177_s3 = inlined_call_operand.hbm [shape: f32[64,128], index: 3, kind: output, shape index: {}]  }
   0x1   :  { %11 = vsyncpa [#allocation6], 0  ;;  %s132_s12 = smov [#allocation4]  }
   0x2   :  { %s21_s13 = sshll.u32 %s132_s12, 4  ;;  %s22_s13 = int_to_ptr.vmem [resolvable:$true] %s21_s13 }
   0x3   :  { %s96_s14 = scalar_lea.vmem %s22_s13, 1024  ;;  %p101_p1 = scmp.lt.s32.totalorder %s22_s13, %s22_s13 }
   0x4   :  { %p97_p0 = scmp.ne.s32.totalorder %s22_s13, %s96_s14  ;;  %p102_p2 = scmp.lt.s32.totalorder %s96_s14, %s96_s14 }
   0x6   :  { %p103_p3 = por %p102_p2, %p101_p1 }
   0x8   :  { %p104_p4 = pnand %p103_p3, %p97_p0 }
   0xa   :  { %107 = shalt.err (!%p104_p4)
}
   0xb   :  { %s133_s15 = smov 128   ;;  %s134_s16 = smov 8  }
   0xc   :  { %27 = dma.hbm_to_vmem [thread:$0]  %s176_s2, 1024, %s22_s13, [#allocation5], %s133_s15, %s133_s15, %s134_s16  }
   0xd   :  { %128 = dma.done.wait [#allocation5], 1024  }
   0xe   :  { %129 = vsyncadd [#allocation5], 4294966272  ;;  %v41_v0 = vstv %s174_s0  ;;  %v33_v1 = vld [vmem:[#allocation4] sm:$0xff]  ;;  %v50_v2 = vstv %s175_s1  ;;  %v34_v3 = vld [vmem:[#allocation4 + $0x8] sm:$0xff]  ;;  %s135_s0 = smov [#allocation7]  }
   0xf   :  { %v35_v4 = vld [vmem:[#allocation4 + $0x10] sm:$0xff]  ;;  %v42_v5 = vmul.f32 %v41_v0, %v33_v1  ;;  %v43_v6 = vmul.f32 %v41_v0, %v34_v3  ;;  %v36_v8 = vld [vmem:[#allocation4 + $0x18] sm:$0xff]  ;;  %v37_v9 = vld [vmem:[#allocation4 + $0x20] sm:$0xff]  ;;  %s72_s2 = sshll.u32 %s135_s0, 4  ;;  %s73_s2 = int_to_ptr.vmem [resolvable:$true] %s72_s2 }
  0x10   :  { %v44_v7 = vmul.f32 %v41_v0, %v35_v4  ;;  %v38_v10 = vld [vmem:[#allocation4 + $0x28] sm:$0xff]  ;;  %v45_v11 = vmul.f32 %v41_v0, %v36_v8  ;;  %v46_v12 = vmul.f32 %v41_v0, %v37_v9  ;;  %v39_v14 = vld [vmem:[#allocation4 + $0x30] sm:$0xff]  ;;  %v40_v15 = vld [vmem:[#allocation4 + $0x38] sm:$0xff]  ;;  %s108_s1 = scalar_lea.vmem %s73_s2, 1024  ;;  %p113_p6 = scmp.lt.s32.totalorder %s73_s2, %s73_s2 }
  0x11   :  { %v47_v13 = vmul.f32 %v41_v0, %v38_v10  ;;  %v51_v16 = vadd.f32 %v50_v2, %v42_v5  ;;  %v52_v17 = vadd.f32 %v50_v2, %v43_v6  ;;  %v48_v19 = vmul.f32 %v41_v0, %v39_v14  ;;  %p109_p5 = scmp.ne.s32.totalorder %s73_s2, %s108_s1  ;;  %p114_p7 = scmp.lt.s32.totalorder %s108_s1, %s108_s1 }
  0x12   :  { %v53_v18 = vadd.f32 %v50_v2, %v44_v7  ;;  %v54_v20 = vadd.f32 %v50_v2, %v45_v11  ;;  %v55_v21 = vadd.f32 %v50_v2, %v46_v12  ;;  %v49_v23 = vmul.f32 %v41_v0, %v40_v15 }
  0x13   :  { %v56_v22 = vadd.f32 %v50_v2, %v47_v13  ;;  %59 = vst [vmem:[#allocation7] sm:$0xff] %v51_v16  ;;  %60 = vst [vmem:[#allocation7 + $0x8] sm:$0xff] %v52_v17  ;;  %v57_v24 = vadd.f32 %v50_v2, %v48_v19  ;;  %p115_p8 = por %p114_p7, %p113_p6 }
  0x14   :  { %61 = vst [vmem:[#allocation7 + $0x10] sm:$0xff] %v53_v18  ;;  %62 = vst [vmem:[#allocation7 + $0x18] sm:$0xff] %v54_v20  ;;  %v58_v25 = vadd.f32 %v50_v2, %v49_v23 }
  0x15   :  { %63 = vst [vmem:[#allocation7 + $0x20] sm:$0xff] %v55_v21  ;;  %64 = vst [vmem:[#allocation7 + $0x28] sm:$0xff] %v56_v22  ;;  %p116_p9 = pnand %p115_p8, %p109_p5 }
  0x16   :  { %65 = vst [vmem:[#allocation7 + $0x30] sm:$0xff] %v57_v24  ;;  %66 = vst [vmem:[#allocation7 + $0x38] sm:$0xff] %v58_v25 }
  0x17   :  { %119 = shalt.err (!%p116_p9)
}
  0x18   :  { %78 = dma.vmem_to_hbm [thread:$0]  %s73_s2, 1024, %s177_s3, [#allocation6], %s133_s15, %s133_s15, %s134_s16  }
  0x19   :  { %130 = dma.done.wait [#allocation6], 1024  }
  0x1a   :  { %131 = vsyncadd [#allocation6], 4294966272 }
  0x1b   :  { %82 = vsyncpa [#allocation5], 1 }
  0x1c   :  { %83 = vsyncpa [#allocation6], 1 }

</bundles_post_ra>
